<compile_context>
chip_gen: v5e
topology: v5e:2x2
jax: 0.10.0
libtpu: 0.0.40
codegen_flags: <defaults>
</compile_context>

<pallas_src>
import functools
import math

import jax
import jax.numpy as jnp
from jax import lax
from jax.experimental import pallas as pl
from jax.experimental.pallas import tpu as pltpu

_LANES = 128
_TARGET_BLOCK_BYTES = 2 * 1024 * 1024   # per-input block (double-buffered)
_MAX_ACC_ROWS = 64                      # accumulator sublane rows (8 vregs)


def _sq_err_kernel(y_ref, yh_ref, o_ref, acc_ref, *, block_rows, acc_rows,
                   rows_total, num_full_blocks, n_inner, needs_mask, unroll):
    """Accumulate sum((y - y_hat)^2) into an (acc_rows, 128) VMEM accumulator."""
    i = pl.program_id(1)
    blk = pl.program_id(0) * n_inner + i          # global (unclamped) block id
    n_chunks = block_rows // acc_rows

    @pl.when(i == 0)
    def _():
        acc_ref[...] = jnp.zeros_like(acc_ref)

    def accumulate(masked):
        if masked:
            valid_rows = rows_total - blk * block_rows  # may be <= 0 (phantom)

        def body(j, carry):
            off = pl.multiple_of(j * acc_rows, acc_rows)
            d = (y_ref[pl.ds(off, acc_rows), :].astype(jnp.float32)
                 - yh_ref[pl.ds(off, acc_rows), :].astype(jnp.float32))
            sq = d * d
            if masked:
                row = lax.broadcasted_iota(
                    jnp.int32, (acc_rows, _LANES), 0) + off
                # Select (not multiply): OOB rows may hold NaN/Inf garbage.
                sq = jnp.where(row < valid_rows, sq, 0.0)
            acc_ref[...] += sq
            return carry

        lax.fori_loop(0, n_chunks, body, 0, unroll=unroll)

    if needs_mask:
        @pl.when(blk < num_full_blocks)
        def _():
            accumulate(False)

        @pl.when(blk >= num_full_blocks)
        def _():
            accumulate(True)
    else:
        accumulate(False)

    @pl.when(i == n_inner - 1)
    def _():
        # Single cross-lane reduce per partial-sum slot.
        o_ref[0, 0] = jnp.sum(acc_ref[...])


def supervision_loss(y, y_hat, extra_args=None, *, block_rows_cap=None):
    """MSE supervision loss. y, y_hat: any shape (e.g. NCHW). Returns f32 scalar."""
    del extra_args  # abstract signature carries it; unused here
    assert y.shape == y_hat.shape

    n = y.size
    inv_n = jnp.float32(1.0 / float(n))

    rows, rem = divmod(n, _LANES)

    if rem != 0 or rows < 8:
        # Misaligned (n % 128 != 0) or tiny input: a fused XLA
        # elementwise+reduce is a single HBM pass (2n bytes read) -- already
        # at the roofline and cheaper than any kernel path that would need a
        # materialized prefix-slice copy (~3x the traffic).
        d = y.astype(jnp.float32) - y_hat.astype(jnp.float32)
        return jnp.sum(d * d) * inv_n

    y2d = y.reshape(rows, _LANES)        # free row-major reshape
    yh2d = y_hat.reshape(rows, _LANES)

    itemsize = max(jnp.dtype(y.dtype).itemsize, jnp.dtype(y_hat.dtype).itemsize)
    max_rows = _TARGET_BLOCK_BYTES // (_LANES * itemsize)  # 4096 f32 / 8192 bf16
    if block_rows_cap is not None:
        max_rows = min(max_rows, block_rows_cap)
    block_rows = min(max_rows, (rows // 8) * 8)
    block_rows = max(8, (block_rows // 8) * 8)

    num_blocks = pl.cdiv(rows, block_rows)      # real blocks
    num_full_blocks = rows // block_rows        # blocks with no OOB rows

    # Unconditional 2-way split of the leading (parallel) axis whenever there
    # is more than one block, so v7x's second TensorCore never sits idle.
    n_outer = 2 if num_blocks >= 2 else 1
    n_inner = pl.cdiv(num_blocks, n_outer)
    needs_mask = (n_outer * n_inner * block_rows) != rows

    acc_rows = math.gcd(block_rows, _MAX_ACC_ROWS)   # multiple of 8, divides block
    n_chunks = block_rows // acc_rows
    unroll = min(8, n_chunks)

    max_blk = num_blocks - 1

    def idx_map(p, i):
        # Clamp phantom blocks (from rounding the block count up to a multiple
        # of n_outer) onto the last real block; their contribution is zeroed
        # in-kernel by the mask branch.
        return (jnp.minimum(p * n_inner + i, max_blk), 0)

    kernel = functools.partial(
        _sq_err_kernel,
        block_rows=block_rows,
        acc_rows=acc_rows,
        rows_total=rows,
        num_full_blocks=num_full_blocks,
        n_inner=n_inner,
        needs_mask=needs_mask,
        unroll=unroll,
    )

    partials = pl.pallas_call(
        kernel,
        out_shape=jax.ShapeDtypeStruct((n_outer, 1), jnp.float32),
        grid=(n_outer, n_inner),
        in_specs=[
            pl.BlockSpec((block_rows, _LANES), idx_map),
            pl.BlockSpec((block_rows, _LANES), idx_map),
        ],
        out_specs=pl.BlockSpec((1, 1), lambda p, i: (p, 0),
                               memory_space=pltpu.SMEM),
        scratch_shapes=[pltpu.VMEM((acc_rows, _LANES), jnp.float32)],
        compiler_params=pltpu.CompilerParams(
            dimension_semantics=("parallel", "arbitrary")),
        cost_estimate=pl.CostEstimate(
            flops=3 * rows * _LANES,
            transcendentals=0,
            bytes_accessed=2 * rows * _LANES * itemsize + 4 * n_outer),
    )(y2d, yh2d)

    return jnp.sum(partials) * inv_n


if __name__ == "__main__":
    key = jax.random.PRNGKey(0)
    ky, kh = jax.random.split(key)

    # Primary small NCHW example consistent with a dense supervision loss.
    y = jax.random.normal(ky, (2, 4, 16, 16), dtype=jnp.float32)
    y_hat = jax.random.normal(kh, (2, 4, 16, 16), dtype=jnp.float32)
    loss = jax.jit(supervision_loss)(y, y_hat, extra_args={})
    jax.block_until_ready(loss)
    ref = jnp.mean((y - y_hat) ** 2)
    assert jnp.allclose(loss, ref, rtol=1e-4, atol=1e-6), (loss, ref)

    # Multi-block path: even block count, masked partial last block, 2-way split.
    kb1, kb2 = jax.random.split(kh)
    yb = jax.random.normal(kb1, (2, 4, 30, 128), dtype=jnp.float32)
    yhb = jax.random.normal(kb2, (2, 4, 30, 128), dtype=jnp.float32)
    refb = jnp.mean((yb - yhb) ** 2)
    lb = supervision_loss(yb, yhb, extra_args=None, block_rows_cap=64)
    assert jnp.allclose(lb, refb, rtol=1e-4, atol=1e-6), (lb, refb)

    # Odd block count -> phantom block on the 2-way core split
    # (clamped index_map + fully-masked zero contribution).
    lc = supervision_loss(yb, yhb, extra_args=None, block_rows_cap=80)
    assert jnp.allclose(lc, refb, rtol=1e-4, atol=1e-6), (lc, refb)

    # Misaligned size (n % 128 != 0): plain-JAX roofline fallback (no copies).
    kd1, kd2 = jax.random.split(kb1)
    yd = jax.random.normal(kd1, (2, 3, 5, 7), dtype=jnp.float32)
    yhd = jax.random.normal(kd2, (2, 3, 5, 7), dtype=jnp.float32)
    ld = supervision_loss(yd, yhd, extra_args=None)
    refd = jnp.mean((yd - yhd) ** 2)
    assert jnp.allclose(ld, refd, rtol=1e-4, atol=1e-6), (ld, refd)

    jax.block_until_ready((lb, lc, ld))
    print("KERNEL_OK")
</pallas_src>

<mosaic_0001>
module attributes {stable_mosaic.version = 11 : i64} {
  func.func @_sq_err_kernel(%arg0: i32, %arg1: i32, %arg2: memref<16x128xf32, #tpu.memory_space<vmem>>, %arg3: memref<16x128xf32, #tpu.memory_space<vmem>>, %arg4: memref<1x1xf32, #tpu.memory_space<smem>>, %arg5: memref<16x128xf32, #tpu.memory_space<vmem>>) attributes {dimension_semantics = [#tpu.dimension_semantics<parallel>, #tpu.dimension_semantics<arbitrary>], iteration_bounds = array<i64: 1, 1>, scalar_prefetch = 0 : i64, scratch_operands = 1 : i64, tpu.core_type = #tpu.core_type<tc>, window_params = [{transform_indices = @transform_0, window_bounds = array<i64: 16, 128>}, {transform_indices = @transform_1, window_bounds = array<i64: 16, 128>}, {transform_indices = @transform_2, window_bounds = array<i64: 1, 1>}]} {
    %c0_i32 = arith.constant 0 : i32
    %0 = arith.cmpi eq, %arg1, %c0_i32 : i32
    %1 = arith.extui %0 : i1 to i32
    %c0_i32_0 = arith.constant 0 : i32
    %2 = arith.cmpi ne, %1, %c0_i32_0 : i32
    scf.if %2 {
      %cst = arith.constant 0.000000e+00 : f32
      %17 = vector.broadcast %cst : f32 to vector<16x128xf32>
      %c0_9 = arith.constant 0 : index
      %c0_10 = arith.constant 0 : index
      %18 = vector.load %arg5[%c0_9, %c0_10] : memref<16x128xf32, #tpu.memory_space<vmem>>, vector<16x128xf32>
      tpu.vector_store %arg5[%c0_9, %c0_10], %17 {strides = array<i32>} : memref<16x128xf32, #tpu.memory_space<vmem>>, vector<16x128xf32>,
    } else {
    }
    %c0_i32_1 = arith.constant 0 : i32
    %c16_i32 = arith.constant 16 : i32
    %3 = arith.muli %c0_i32_1, %c16_i32 : i32
    %4 = tpu.assume_multiple %3, 16 : i32
    %5 = arith.index_cast %4 : i32 to index
    %c0 = arith.constant 0 : index
    %6 = vector.load %arg2[%5, %c0] : memref<16x128xf32, #tpu.memory_space<vmem>>, vector<16x128xf32>
    %7 = arith.index_cast %4 : i32 to index
    %c0_2 = arith.constant 0 : index
    %8 = vector.load %arg3[%7, %c0_2] : memref<16x128xf32, #tpu.memory_space<vmem>>, vector<16x128xf32>
    %9 = arith.subf %6, %8 : vector<16x128xf32>
    %10 = arith.mulf %9, %9 : vector<16x128xf32>
    %c0_3 = arith.constant 0 : index
    %c0_4 = arith.constant 0 : index
    %11 = vector.load %arg5[%c0_3, %c0_4] : memref<16x128xf32, #tpu.memory_space<vmem>>, vector<16x128xf32>
    %12 = arith.addf %11, %10 : vector<16x128xf32>
    %c0_5 = arith.constant 0 : index
    %c0_6 = arith.constant 0 : index
    %13 = vector.load %arg5[%c0_5, %c0_6] : memref<16x128xf32, #tpu.memory_space<vmem>>, vector<16x128xf32>
    tpu.vector_store %arg5[%c0_5, %c0_6], %12 {strides = array<i32>} : memref<16x128xf32, #tpu.memory_space<vmem>>, vector<16x128xf32>,
    %c1_i32 = arith.constant 1 : i32
    %c0_i32_7 = arith.constant 0 : i32
    %14 = arith.cmpi eq, %arg1, %c0_i32_7 : i32
    %15 = arith.extui %14 : i1 to i32
    %c0_i32_8 = arith.constant 0 : i32
    %16 = arith.cmpi ne, %15, %c0_i32_8 : i32
    scf.if %16 {
      %c0_9 = arith.constant 0 : index
      %c0_10 = arith.constant 0 : index
      %17 = vector.load %arg5[%c0_9, %c0_10] : memref<16x128xf32, #tpu.memory_space<vmem>>, vector<16x128xf32>
      %18 = vector.shape_cast %17 : vector<16x128xf32> to vector<1x16x128xf32>
      %cst = arith.constant dense<0.000000e+00> : vector<1xf32>
      %19 = vector.multi_reduction <add>, %18, %cst [1, 2] : vector<1x16x128xf32> to vector<1xf32>
      %20 = vector.shape_cast %19 : vector<1xf32> to vector<1x1x1xf32>
      %21 = vector.extract %20[0, 0, 0] : f32 from vector<1x1x1xf32>
      %c0_11 = arith.constant 0 : index
      %c0_12 = arith.constant 0 : index
      %22 = memref.load %arg4[%c0_11, %c0_12] : memref<1x1xf32, #tpu.memory_space<smem>>
      memref.store %21, %arg4[%c0_11, %c0_12] : memref<1x1xf32, #tpu.memory_space<smem>>
    } else {
    }
    return
  }
  func.func @transform_0(%arg0: i32, %arg1: i32) -> (i32, i32) {
    %c1_i32 = arith.constant 1 : i32
    %0 = arith.muli %arg0, %c1_i32 : i32
    %1 = arith.addi %0, %arg1 : i32
    %c0_i32 = arith.constant 0 : i32
    %2 = arith.minsi %1, %c0_i32 : i32
    %c0_i32_0 = arith.constant 0 : i32
    %c0_i32_1 = arith.constant 0 : i32
    return %2, %c0_i32_0 : i32, i32
  }
  func.func @transform_1(%arg0: i32, %arg1: i32) -> (i32, i32) {
    %c1_i32 = arith.constant 1 : i32
    %0 = arith.muli %arg0, %c1_i32 : i32
    %1 = arith.addi %0, %arg1 : i32
    %c0_i32 = arith.constant 0 : i32
    %2 = arith.minsi %1, %c0_i32 : i32
    %c0_i32_0 = arith.constant 0 : i32
    %c0_i32_1 = arith.constant 0 : i32
    return %2, %c0_i32_0 : i32, i32
  }
  func.func @transform_2(%arg0: i32, %arg1: i32) -> (i32, i32) {
    %c0_i32 = arith.constant 0 : i32
    %c0_i32_0 = arith.constant 0 : i32
    return %arg0, %c0_i32 : i32, i32
  }
}

</mosaic_0001>

<bundles_post_ra>
// kernel: supervision_loss.1
= control target key start
LH: loop header
LB: loop body
LE: loop exit
PB: predicated region body
PF: predicated region fallthrough
CT: control target
= control target key end

     0   :  { %s188_s0 = inlined_call_operand.vmem [shape: f32[16,128], index: 0, kind: input, shape index: {}]   ;;  %s189_s1 = inlined_call_operand.vmem [shape: f32[16,128], index: 1, kind: input, shape index: {}]   ;;  %s190_s2 = inlined_call_operand.hbm [shape: f32[1,1], index: 2, kind: output, shape index: {}]  }
   0x1   :  { %v82_v0 = vld [vmem:[%s188_s0] sm:$0xff]  ;;  %v83_v1 = vld [vmem:[%s188_s0 + $0x8] sm:$0xff] }
   0x2   :  { %v84_v2 = vld [vmem:[%s189_s1] sm:$0xff]  ;;  %v85_v3 = vld [vmem:[%s189_s1 + $0x8] sm:$0xff] }
   0x3   :  { %v86_v4 = vsub.f32 %v82_v0, %v84_v2 }
   0x4   :  { %7 = vsyncpa [#allocation4], 0  ;;  %v87_v5 = vsub.f32 %v83_v1, %v85_v3  ;;  %s118_s18 = sshll.u32 %s190_s2, 4  ;;  %s157_s19 = smov [#allocation3]   ;;  %s119_s18 = int_to_ptr.hbm [resolvable:$true] %s118_s18 }
   0x5   :  { %v88_v6 = vmul.f32 %v86_v4, %v86_v4 }
   0x6   :  { %v89_v7 = vmul.f32 %v87_v5, %v87_v5 }
   0x8   :  { %v101_v8 = vadd.f32 %v89_v7, %v88_v6 }
   0xa   :  { %102 = vadd.xlane.f32.xlu0 %v101_v8 }
  0x7d   :  { %v103_v9 = vpop.xlane.xlu0 %102 }
  0x7e   :  { %v104_v10 = vrot.slane %v103_v9, 4 }
  0x80   :  { %v105_v11 = vadd.f32 %v104_v10, %v103_v9 }
  0x82   :  { %v106_v12 = vrot.slane %v105_v11, 2 }
  0x84   :  { %v107_v13 = vadd.f32 %v106_v12, %v105_v11 }
  0x86   :  { %v108_v14 = vrot.slane %v107_v13, 1 }
  0x88   :  { %v109_v15 = vadd.f32 %v108_v14, %v107_v13 }
  0x8a   :  { %140 = vpush %v109_v15 }
  0xbb   :  { %s141_s1 = spop %140 }
  0xbc   :  { %112 = sst [smem:[#allocation3]] %s141_s1 }
  0xbd   :  { %121 = dma.smem_to_hbm %s157_s19, 16, %s119_s18, [#allocation4]  }
  0xbe   :  { %155 = dma.done.wait [#allocation4], 16  }
  0xbf   :  { %156 = vsyncadd [#allocation4], 4294967280 }
  0xc0   :  { %126 = sfence }
  0xc1   :  { %127 = vsyncpa [#allocation4], 1 }

</bundles_post_ra>
